<compile_context>
chip_gen: v7x
topology: tpu7x:2x2x1
jax: 0.10.0
libtpu: 0.0.40
codegen_flags: <defaults>
</compile_context>

<pallas_src>
import jax
import jax.numpy as jnp
from jax.experimental import pallas as pl
from jax.experimental.pallas import tpu as pltpu


def _fold_branch_params(weights, biases, scale, matmul_dtype):
    """Fold scale + all branch 1x1 convs into one (C,C) matmul + (C,1) bias.

    weights: (num_blocks, C_in, C_out)  per-branch 1x1 conv, (in, out) orientation.
    biases:  (num_blocks, C_out)
    Returns wT: (C_out, C_in) in matmul_dtype (for Y = W'^T @ X), b_col: (C_out, 1) f32.
    The identity / skip path is NOT folded in; it is added in f32 inside the kernel.
    """
    c = weights.shape[1]
    w_sum = jnp.float32(scale) * jnp.sum(weights.astype(jnp.float32), axis=0)   # (in, out)
    b_sum = jnp.float32(scale) * jnp.sum(biases.astype(jnp.float32), axis=0)    # (out,)
    wT = w_sum.T.astype(matmul_dtype)          # (out, in)
    b_col = b_sum.reshape(c, 1)                # broadcasts over the lane (spatial) dim
    return wT, b_col


def _folded_kernel(x_ref, wT_ref, b_ref, o_ref):
    # x_ref : (nb, C, t_hw) float32  — input tile (read once from HBM, cast in-vreg)
    # wT_ref: (C, C)        bf16     — (scale * sum_b W_b)^T, resident across the grid
    # b_ref : (C, 1)        float32  — scale * sum_b bias_b
    # o_ref : (nb, C, t_hw)
    wT = wT_ref[...]
    b = b_ref[...]
    nb = x_ref.shape[0]
    for i in range(nb):                        # static unroll; nb is compile-time
        xb = x_ref[i]                          # (C, t_hw) f32
        # MXU matmul, bf16 inputs, f32 accumulation (in-kernel cast: VPU, free here).
        y = jnp.dot(wT, xb.astype(wT.dtype), preferred_element_type=jnp.float32)
        # Skip connection in exact f32 (module semantics); bias broadcasts over lanes.
        o_ref[i] = jnp.maximum(y + xb + b, 0.0).astype(o_ref.dtype)


def _choose_nb(n, c, hw, tile_hw, x_bytes, out_bytes, target_bytes=2 << 20):
    """Images per grid step: grow the block toward ~2 MiB but keep >= 2 grid
    steps whenever possible so both v7x TensorCores get work."""
    per_image = c * tile_hw * (x_bytes + out_bytes)
    steps_hw = hw // tile_hw
    nb = 1
    for cand in range(1, n + 1):
        if n % cand != 0:
            continue
        if cand > 1 and (n // cand) * steps_hw < 2:
            break
        if cand * per_image <= target_bytes:
            nb = cand
        else:
            break
    return nb


def multi_residual(x_nchw, weights, biases, scale, *,
                   tile_hw=None, matmul_dtype=jnp.bfloat16, out_dtype=None):
    """out = relu(x + scale * sum_b conv1x1_b(x)), x in NCHW (float32).

    weights: (num_blocks, C, C) in (in_c, out_c) orientation; biases: (num_blocks, C).
    out_dtype: defaults to x dtype; pass jnp.bfloat16 to halve store-side traffic
    if downstream consumers accept it.
    """
    n, c, h, w = x_nchw.shape
    hw = h * w
    x_bytes = 4                                    # kernel reads f32 directly
    out_dtype = x_nchw.dtype if out_dtype is None else out_dtype
    out_bytes = jnp.dtype(out_dtype).itemsize

    if tile_hw is None:
        # Lane-dense tile: whole image if it fits, otherwise the largest
        # 128-multiple divisor of hw keeping the per-image block around <= 2 MiB.
        tile_hw = hw
        max_tile = max(128, ((2 << 20) // (c * (x_bytes + out_bytes))) // 128 * 128)
        if tile_hw > max_tile:
            t = max_tile
            while t >= 128 and hw % t != 0:
                t -= 128
            tile_hw = t if t >= 128 else hw

    # TODO(synk): general shapes (C % 8 != 0 or H*W % 128 != 0) need padding or
    # pl.cdiv + masked stores; kept as asserts for this demo.
    assert c % 8 == 0, "channel dim must be a multiple of 8 (f32 sublane tile)"
    # (C % 16 keeps the bf16 (C,C) weight block in native packing; C=32 here.)
    assert hw % 128 == 0 and tile_hw % 128 == 0 and hw % tile_hw == 0

    nb = _choose_nb(n, c, hw, tile_hw, x_bytes, out_bytes)
    assert n % nb == 0

    x3 = x_nchw.reshape(n, c, hw)                      # no transpose, no cast
    wT, b_col = _fold_branch_params(weights, biases, scale, matmul_dtype)

    grid = (n // nb, hw // tile_hw)

    # VMEM budget: double-buffered x/out blocks + resident weight/bias (the
    # default pipeline still allocates 2 buffers for the constant-index weight).
    block_bytes = nb * c * tile_hw * (x_bytes + out_bytes)
    vmem_needed = 2 * block_bytes + 2 * c * c * jnp.dtype(matmul_dtype).itemsize + 2 * c * 4
    # Stay within v7x's 64 MiB physical per TC; raise scoped limit only as needed.
    vmem_limit = int(min(max(2 * vmem_needed, 32 * 1024 * 1024), 60 * 1024 * 1024))
    assert vmem_needed <= 60 * 1024 * 1024, "tile too large for v7x VMEM; shrink tile_hw/nb"

    cost = pl.CostEstimate(
        flops=2 * n * hw * c * c,
        transcendentals=0,
        bytes_accessed=(n * c * hw * (x_bytes + out_bytes)
                        + c * c * jnp.dtype(matmul_dtype).itemsize + c * 4),
    )

    out3 = pl.pallas_call(
        _folded_kernel,
        out_shape=jax.ShapeDtypeStruct((n, c, hw), out_dtype),
        grid_spec=pltpu.PrefetchScalarGridSpec(
            num_scalar_prefetch=0,
            grid=grid,
            in_specs=[
                # x tile: (nb, C, tile_hw) float32.
                pl.BlockSpec((nb, c, tile_hw), lambda i, s: (i, 0, s)),
                # Folded weight / bias: constant index_map -> resident in VMEM,
                # only x / out are actually pipelined.
                # TODO(synk): at real polynet C (~1-2K) single-buffer this with
                # pipeline_mode=pl.Buffered(1) to halve its VMEM footprint on v7x.
                pl.BlockSpec((c, c), lambda i, s: (0, 0)),
                pl.BlockSpec((c, 1), lambda i, s: (0, 0)),
            ],
            out_specs=pl.BlockSpec((nb, c, tile_hw), lambda i, s: (i, 0, s)),
        ),
        compiler_params=pltpu.CompilerParams(
            dimension_semantics=("parallel", "parallel"),
            vmem_limit_bytes=vmem_limit,
        ),
        cost_estimate=cost,
    )(x3, wT, b_col)

    return out3.reshape(n, c, h, w)


if __name__ == "__main__":
    # Small feature-map shapes: N=2, C=32, H=W=16  (H*W = 256 -> lane-dense).
    N, C, H, W = 2, 32, 16, 16
    NUM_BLOCKS = 2          # "2-way" module, as in polynet
    SCALE = 0.3

    key = jax.random.PRNGKey(0)
    kx, kw, kb = jax.random.split(key, 3)

    x = jax.random.normal(kx, (N, C, H, W), dtype=jnp.float32)
    # Deterministic synthetic per-branch 1x1 conv parameters, (in_c, out_c).
    weights = 0.05 * jax.random.normal(kw, (NUM_BLOCKS, C, C), dtype=jnp.float32)
    biases = 0.01 * jax.random.normal(kb, (NUM_BLOCKS, C), dtype=jnp.float32)

    out = multi_residual(x, weights, biases, SCALE)
    out = jax.block_until_ready(out)

    # --- Check 1: tight check against a numerics-matched reference
    #     (branch matmul through bf16, skip connection and bias in exact f32).
    wT, b_col = _fold_branch_params(weights, biases, SCALE, jnp.bfloat16)
    x3 = x.reshape(N, C, H * W)
    branch = jnp.einsum("oi,nis->nos", wT.astype(jnp.float32),
                        x3.astype(jnp.bfloat16).astype(jnp.float32),
                        precision=jax.lax.Precision.HIGHEST)
    tight = jnp.maximum(branch + x3 + b_col[None], 0.0).reshape(N, C, H, W)
    assert jnp.allclose(out, tight, atol=1e-4, rtol=1e-4), "mismatch vs folded reference"

    # --- Check 2: original PyTorch module semantics (per-branch pure f32 loop).
    #     Only the scaled branch term goes through bf16, so the tolerance is tight-ish.
    x_rows = jnp.transpose(x, (0, 2, 3, 1)).reshape(-1, C)
    ref = x_rows
    for b in range(NUM_BLOCKS):
        ref = ref + SCALE * (x_rows @ weights[b] + biases[b])
    ref = jnp.maximum(ref, 0.0)
    ref = jnp.transpose(ref.reshape(N, H, W, C), (0, 3, 1, 2))
    assert jnp.allclose(out, ref, atol=2e-2, rtol=2e-2), "mismatch vs module semantics"

    print("KERNEL_OK")
</pallas_src>

<mosaic_0001>
module attributes {stable_mosaic.version = 11 : i64} {
  func.func @_folded_kernel(%arg0: i32, %arg1: i32, %arg2: memref<1x32x256xf32, #tpu.memory_space<vmem>>, %arg3: memref<32x32xbf16, #tpu.memory_space<vmem>>, %arg4: memref<32x1xf32, #tpu.memory_space<vmem>>, %arg5: memref<1x32x256xf32, #tpu.memory_space<vmem>>) attributes {dimension_semantics = [#tpu.dimension_semantics<parallel>, #tpu.dimension_semantics<parallel>], iteration_bounds = array<i64: 2, 1>, scalar_prefetch = 0 : i64, scratch_operands = 0 : i64, tpu.core_type = #tpu.core_type<tc>, window_params = [{transform_indices = @transform_0, window_bounds = array<i64: 1, 32, 256>}, {pipeline_mode = #tpu.pipeline_mode<synchronous>, transform_indices = @transform_1, window_bounds = array<i64: 32, 32>}, {pipeline_mode = #tpu.pipeline_mode<synchronous>, transform_indices = @transform_2, window_bounds = array<i64: 32, 1>}, {transform_indices = @transform_3, window_bounds = array<i64: 1, 32, 256>}]} {
    %c0 = arith.constant 0 : index
    %c0_0 = arith.constant 0 : index
    %0 = vector.load %arg3[%c0, %c0_0] : memref<32x32xbf16, #tpu.memory_space<vmem>>, vector<32x32xbf16>
    %c0_1 = arith.constant 0 : index
    %c0_2 = arith.constant 0 : index
    %1 = vector.load %arg4[%c0_1, %c0_2] : memref<32x1xf32, #tpu.memory_space<vmem>>, vector<32x1xf32>
    %c0_3 = arith.constant 0 : index
    %c0_4 = arith.constant 0 : index
    %c0_5 = arith.constant 0 : index
    %2 = vector.load %arg2[%c0_3, %c0_4, %c0_5] : memref<1x32x256xf32, #tpu.memory_space<vmem>>, vector<1x32x256xf32>
    %3 = vector.shape_cast %2 : vector<1x32x256xf32> to vector<32x256xf32>
    %4 = arith.truncf %3 : vector<32x256xf32> to vector<32x256xbf16>
    %cst = arith.constant dense<0.000000e+00> : vector<32x256xf32>
    %5 = tpu.matmul %0, %4, %cst {dimension_numbers = #tpu.dot_dimension_numbers<[1], [0], [0], [1], [0, 0, 1, 1], [], []>} : vector<32x32xbf16>, vector<32x256xbf16>, vector<32x256xf32> -> vector<32x256xf32>
    %6 = arith.addf %5, %3 : vector<32x256xf32>
    %7 = vector.broadcast %1 : vector<32x1xf32> to vector<32x256xf32>
    %8 = arith.addf %6, %7 : vector<32x256xf32>
    %cst_6 = arith.constant 0.000000e+00 : f32
    %9 = vector.broadcast %cst_6 : f32 to vector<32x256xf32>
    %10 = arith.maximumf %8, %9 : vector<32x256xf32>
    %c0_7 = arith.constant 0 : index
    %c0_8 = arith.constant 0 : index
    %c0_9 = arith.constant 0 : index
    %11 = vector.load %arg5[%c0_7, %c0_8, %c0_9] : memref<1x32x256xf32, #tpu.memory_space<vmem>>, vector<1x32x256xf32>
    %12 = vector.shape_cast %11 : vector<1x32x256xf32> to vector<32x256xf32>
    %13 = vector.shape_cast %10 : vector<32x256xf32> to vector<1x32x256xf32>
    tpu.vector_store %arg5[%c0_7, %c0_8, %c0_9], %13 {strides = array<i32>} : memref<1x32x256xf32, #tpu.memory_space<vmem>>, vector<1x32x256xf32>,
    return
  }
  func.func @transform_0(%arg0: i32, %arg1: i32) -> (i32, i32, i32) {
    %c0_i32 = arith.constant 0 : i32
    %c0_i32_0 = arith.constant 0 : i32
    return %arg0, %c0_i32, %arg1 : i32, i32, i32
  }
  func.func @transform_1(%arg0: i32, %arg1: i32) -> (i32, i32) {
    %c0_i32 = arith.constant 0 : i32
    %c0_i32_0 = arith.constant 0 : i32
    %c0_i32_1 = arith.constant 0 : i32
    return %c0_i32, %c0_i32_0 : i32, i32
  }
  func.func @transform_2(%arg0: i32, %arg1: i32) -> (i32, i32) {
    %c0_i32 = arith.constant 0 : i32
    %c0_i32_0 = arith.constant 0 : i32
    %c0_i32_1 = arith.constant 0 : i32
    return %c0_i32, %c0_i32_0 : i32, i32
  }
  func.func @transform_3(%arg0: i32, %arg1: i32) -> (i32, i32, i32) {
    %c0_i32 = arith.constant 0 : i32
    %c0_i32_0 = arith.constant 0 : i32
    return %arg0, %c0_i32, %arg1 : i32, i32, i32
  }
}

</mosaic_0001>

<bundles_post_ra>
// kernel: tpu_custom_call.1
= control target key start
LH: loop header
LB: loop body
LE: loop exit
PB: predicated region body
PF: predicated region fallthrough
CT: control target
= control target key end

     0   :  { %8 = vsyncpa [#allocation3], 0  ;;  %s892_s0 = inlined_call_operand.hbm [shape: f32[2,32,256], index: 0, kind: input, shape index: {}]   ;;  %s893_s1 = inlined_call_operand.vmem [shape: bf16[32,32], index: 1, kind: input, shape index: {}]   ;;  %s894_s2 = inlined_call_operand.vmem [shape: f32[32,1], index: 2, kind: input, shape index: {}]   ;;  %s895_s3 = inlined_call_operand.hbm [shape: f32[2,32,256], index: 3, kind: output, shape index: {}]  }
   0x1   :  { %10 = vsyncpa [#allocation3 + $0x1], 0 }
   0x2   :  { %11 = vsyncpa [#allocation4], 0 }
   0x3   :  { %13 = vsyncpa [#allocation4 + $0x1], 0  ;;  %s684_s12 = smov 0   ;;  %s686_s13 = smov 0  }
   0x4   :  { %s688_s14 = smov 0   ;;  %s690_s15 = smov 0  }
   0x5   :  { %s692_s16 = smov 0   ;;  %s694_s17 = smov 0  }
   0x6 LB: > { %s447_s18 = sadd.s32 4294967295, %s655_s17   ;;  %s448_s19 = sadd.s32 4294967294, %s655_s17   ;;  %s655_s17 = sphi %s694_s17, %s19_s17   ;;  %s651_s16 = sphi %s692_s16, %s910_s16   ;;  %s647_s15 = sphi %s690_s15, %s909_s15   ;;  %s643_s14 = sphi %s688_s14, %s908_s14   ;;  %s639_s13 = sphi %s686_s13, %s907_s13   ;;  %s635_s12 = sphi %s684_s12, %s906_s12  }
   0x7   : > { %s31_s20 = sadd.s32 1, %s651_s16  ;;  %s40_s21 = sadd.s32 1, %s643_s14 }
   0x8   : > { %p33_p0 = scmp.ge.s32.totalorder %s31_s20, 2  ;;  %p47_p1 = scmp.ne.s32.totalorder %s643_s14, %s639_s13 }
   0x9   : > { %p48_p2 = scmp.eq.s32.totalorder %s655_s17, 0  ;;  %p53_p3 = scmp.ne.s32.totalorder %s639_s13, %s635_s12 }
   0xa   : > { %s912_s20 = smov (%p33_p0, %s31_s20), 0  ;;  %p54_p5 = scmp.eq.s32.totalorder %s447_s18, 0 }
   0xb   : > { %p725_p4 = por %p48_p2, %p47_p1  ;;  %s35_s23 = ssub.s32 %s651_s16, %s912_s20 }
   0xc   : > { %p121_p6 = scmp.eq.s32.totalorder %s447_s18, 1  ;;  %p38_p7 = scmp.eq.s32.totalorder %s35_s23, 0 }
   0xd   : > { %p731_p8 = por %p54_p5, %p53_p3  ;;  %p127_p10 = scmp.eq.s32.totalorder %s448_s19, 1 }
   0xe   : > { %p735_p9 = por %p121_p6, %p47_p1  ;;  %p484_p13 = scmp.lt.s32.totalorder %s655_s17, 2 }
   0xf   : > { %s740_s26 = scalar_select %p38_p7, %s643_s14, %s40_s21  }
  0x10   : > { %s899_s25 = scalar_select %p735_p9, 1, 0 }
  0x11   : > { %p742_p11 = por %p127_p10, %p53_p3  ;;  %s153_s28 = sand.u32 1, %s643_s14  }
  0x12   : > { %s451_s29 = sshll.u32 %s153_s28, 6  ;;  %s466_s30 = sshll.u32 %s651_s16, 10 }
  0x13   : > { %s900_s27 = scalar_select %p742_p11, 1, 0 }
  0x14   : > { %s753_s6 = scalar_lea.hbm %s892_s0, %s466_s30  ;;  %s157_s7 = scalar_lea.vmem [#allocation2], %s451_s29 }
  0x15   : > { %s166_s8 = sshll.u32 %s157_s7, 4  ;;  %p759_p0 = pnand %p484_p13, %p725_p4  ;;  %s755_s8 = int_to_ptr.vmem [resolvable:$true] %s166_s8 }
  0x16   : > { %s764_s10 = scalar_lea.sflag [#allocation3], %s153_s28  ;;  %s543_s11 = scalar_lea.hbm %s753_s6, 1024 }
  0x17   : > { %p544_p2 = scmp.ne.s32.totalorder %s753_s6, %s543_s11  ;;  %p545_p3 = pneg %p759_p0 }
  0x18   : > { %s548_s21 = scalar_lea.hbm %s892_s0, 2048  ;;  %p549_p4 = scmp.lt.u32.totalorder %s753_s6, %s892_s0 }
  0x19   : > { %p546_p5 = pnand %p545_p3, %p544_p2  ;;  %p550_p7 = scmp.lt.u32.totalorder %s548_s21, %s543_s11 }
  0x1a   : > { %p552_p13 = scmp.lt.u32.totalorder %s543_s11, %s753_s6 }
  0x1b   : > { %p547_p6 = pneg %p546_p5  ;;  %p551_p10 = por %p550_p7, %p549_p4 }
  0x1d   : > { %p553_p12 = por %p552_p13, %p551_p10 }
  0x1f   : > { %p554_p1 = pnand %p553_p12, %p547_p6 }
  0x21   : > { %557 = shalt.err (!%p554_p1)
}
  0x22   : > { %s558_s28 = scalar_lea.vmem %s755_s8, 1024  ;;  %s657_s29 = smov [#allocation2]  }
  0x23   : > { %p559_p2 = scmp.ne.s32.totalorder %s755_s8, %s558_s28  ;;  %s563_s30 = sshll.u32 %s657_s29, 4  ;;  %s564_s30 = int_to_ptr.vmem [resolvable:$false] %s563_s30 }
  0x24   : > { %s565_s4 = scalar_lea.vmem %s564_s30, 2048  ;;  %p566_p9 = scmp.lt.s32.totalorder %s755_s8, %s564_s30 }
  0x25   : > { %p561_p5 = pnand %p559_p2, %p545_p3  ;;  %p567_p4 = scmp.lt.s32.totalorder %s565_s4, %s558_s28 }
  0x27   : > { %p562_p11 = pneg %p561_p5  ;;  %p568_p7 = por %p567_p4, %p566_p9 }
  0x29   : > { %p569_p10 = pnand %p568_p7, %p562_p11 }
  0x2b   : > { %572 = shalt.err (!%p569_p10)
}
  0x2c   : > { %s658_s5 = smov 256   ;;  %s659_s7 = smov 16  }
  0x2d   : > { %479 = dma.hbm_to_vmem [thread:$0]  (!%p759_p0), %s753_s6, 1024, %s755_s8, %s764_s10, %s658_s5, %s658_s5, %s659_s7  }
  0x2e   : > { %p174_p12 = scmp.lt.s32.totalorder %s655_s17, 3  ;;  %p902_p1 = scmp.ge.s32.totalorder %s655_s17, 1 }
  0x30   : > { %p175_p3 = pnand %p902_p1, %p174_p12 }
  0x31   : > { %s796_s11 = sand.u32 (!%p175_p3), 1, %s639_s13  }
  0x32   : > { %178 = sbr.rel (%p175_p3) target bundleno = 305 (0x131), region = 32  ;;  %s455_s18 = sshll.u32 (!%p175_p3), %s796_s11, 6 }
  0x33   : > { %s181_s19 = scalar_lea.sflag (!%p175_p3), [#allocation3], %s796_s11  ;;  %s184_s21 = scalar_lea.vmem (!%p175_p3), [#allocation2], %s455_s18 }
  0x39   : > { %626 = dma.done.wait (%p731_p8), %s181_s19, 1024  }
  0x3a   : > { %628 = vsyncadd (%p731_p8), %s181_s19, 4294966272  ;;  %v660_v0 = vmov 0   ;;  %v219_v1 = vld [vmem:[%s184_s21 + $0x8] sm:$0xff]  ;;  %v221_v2 = vld [vmem:[%s184_s21 + $0x18] sm:$0xff]  ;;  %vm240_vm0 = vcmask 261120   ;;  %s826_s7 = scalar_lea.vmem [#allocation5], %s455_s18 }
  0x3b   : > { %279 = vmatprep.mubr.bf16.mxu0 %v660_v0  ;;  %289 = vmatprep.mubr.bf16.mxu1 %v660_v0  ;;  %v218_v3 = vld [vmem:[%s184_s21] sm:$0xff]  ;;  %v227_v4 = vpack.c.bf16 %v221_v2, %v219_v1  ;;  %v220_v5 = vld [vmem:[%s184_s21 + $0x10] sm:$0xff]  ;;  %v223_v6 = vld [vmem:[%s184_s21 + $0x28] sm:$0xff]  ;;  %s360_s19 = sshll.u32 %s826_s7, 4  ;;  %s345_s6 = scalar_lea.sflag [#allocation4], %s796_s11  ;;  %s830_s19 = int_to_ptr.vmem [resolvable:$true] %s360_s19 }
  0x3c   : > { %540 = vset.pattern.permute.xlu1 %v660_v0  ;;  %539 = vset.pattern.permute.xlu0 %v660_v0  ;;  %v225_v7 = vld [vmem:[%s184_s21 + $0x38] sm:$0xff]  ;;  %v226_v8 = vpack.c.bf16 %v220_v5, %v218_v3  ;;  %v222_v10 = vld [vmem:[%s184_s21 + $0x20] sm:$0xff]  ;;  %v224_v11 = vld [vmem:[%s184_s21 + $0x30] sm:$0xff]  ;;  %s467_s21 = sshll.u32 %s647_s15, 10  ;;  %s573_s8 = scalar_lea.vmem %s830_s19, 1024 }
  0x3d   : > { %v229_v9 = vpack.c.bf16 %v225_v7, %v223_v6  ;;  %247 = vmatprep.subr.bf16.mxu0 %v227_v4  ;;  %468 = vmatprep.subr.bf16.mxu1 %v227_v4  ;;  %v228_v12 = vpack.c.bf16 %v224_v11, %v222_v10  ;;  %v216_v13 = vld [vmem:[%s894_s2 + $0x10] sm:$0xff]  ;;  %v214_v14 = vld [vmem:[%s894_s2] sm:$0xff]  ;;  %v542_v16 = vld [vmem:[%s893_s1 + $0x8] sm:$0xff]   ;;  %s837_s24 = scalar_lea.hbm %s895_s3, %s467_s21  ;;  %p574_p8 = scmp.ne.s32.totalorder %s830_s19, %s573_s8 }
  0x3e   : > { %248 = vmatpush1.bf16.msra.mxu0 %v226_v8  ;;  %470 = vmatpush1.bf16.msra.mxu1 %v226_v8  ;;  %v541_v15 = vld [vmem:[%s893_s1] sm:$0xff]   ;;  %v217_v17 = vld [vmem:[%s894_s2 + $0x18] sm:$0xff]  ;;  %v215_v18 = vld [vmem:[%s894_s2 + $0x8] sm:$0xff]  ;;  %p903_p9 = scmp.ne.s32.totalorder %s899_s25, 0  ;;  %s661_s9 = smov [#allocation5]  }
  0x3f   : > { %249 = vmatprep.subr.bf16.mxu0 %v229_v9  ;;  %469 = vmatprep.subr.bf16.mxu1 %v229_v9  ;;  %s577_s10 = sshll.u32 %s661_s9, 4  ;;  %s578_s10 = int_to_ptr.vmem [resolvable:$false] %s577_s10 }
  0x40   : > { %312 = vperm.xlu1 %540, %v216_v13   ;;  %302 = vperm.xlu0 %539, %v214_v14   ;;  %p575_p11 = pnand %p574_p8, %p903_p9  ;;  %s579_s22 = scalar_lea.vmem %s578_s10, 2048 }
  0x41   : > { %p580_p6 = scmp.lt.s32.totalorder %s830_s19, %s578_s10  ;;  %p581_p13 = scmp.lt.s32.totalorder %s579_s22, %s573_s8 }
  0x42   : > { %250 = vmatpush1.bf16.msra.mxu0 %v228_v12  ;;  %471 = vmatpush1.bf16.msra.mxu1 %v228_v12  ;;  %p576_p0 = pneg %p575_p11 }
  0x43   : > { %p582_p2 = por %p581_p13, %p580_p6 }
  0x44   : > { %317 = vperm.xlu1 %540, %v217_v17   ;;  %307 = vperm.xlu0 %539, %v215_v18  }
  0x45   : > { %459 = vmatmul.mubr.msk.bf16.vlgmr.msra.gmra.mrb[0].mxu0 %vm240_vm0, %v541_v15  ;;  %460 = vmatmul.mubr.msk.bf16.vlgmr.msra.gmra.mrb[0].mxu1 %vm240_vm0, %v542_v16  ;;  %p583_p5 = pnand %p582_p2, %p576_p0 }
  0xbf   : > { %v313_v19 = vpop.permute.xlu1 %312  ;;  %v303_v20 = vpop.permute.xlu0 %302 }
  0xc3   : > { %v318_v37 = vpop.permute.xlu1 %317  ;;  %v308_v38 = vpop.permute.xlu0 %307 }
 0x118   : > { %v281_v21 = vpop.f32.mrb[0].mxu0  ;;  %v291_v22 = vpop.f32.mrb[0].mxu1 }
 0x119   : > { %v282_v23 = vadd.f32 %v281_v21, %v218_v3  ;;  %v292_v24 = vadd.f32 %v291_v22, %v222_v10  ;;  %v283_v25 = vpop.f32.mrb[1].mxu0  ;;  %v293_v26 = vpop.f32.mrb[1].mxu1 }
 0x11a   : > { %v284_v27 = vadd.f32 %v283_v25, %v219_v1  ;;  %v294_v28 = vadd.f32 %v293_v26, %v223_v6  ;;  %v285_v29 = vpop.f32.mrb[2].mxu0  ;;  %v295_v30 = vpop.f32.mrb[2].mxu1 }
 0x11b   : > { %v320_v31 = vadd.f32 %v303_v20, %v282_v23  ;;  %v324_v32 = vadd.f32 %v313_v19, %v292_v24  ;;  %v286_v33 = vadd.f32 %v285_v29, %v220_v5  ;;  %v296_v34 = vadd.f32 %v295_v30, %v224_v11  ;;  %v287_v35 = vpop.f32.mrb[3].mxu0  ;;  %v297_v36 = vpop.f32.mrb[3].mxu1 }
 0x11c   : > { %v321_v39 = vadd.f32 %v303_v20, %v284_v27  ;;  %v325_v40 = vadd.f32 %v313_v19, %v294_v28  ;;  %v288_v41 = vadd.f32 %v287_v35, %v221_v2  ;;  %v298_v42 = vadd.f32 %v297_v36, %v225_v7 }
 0x11d   : > { %v328_v43 = vmax.f32 %v320_v31, 0.0  ;;  %v332_v44 = vmax.f32 %v324_v32, 0.0  ;;  %v322_v45 = vadd.f32 %v308_v38, %v286_v33  ;;  %v326_v46 = vadd.f32 %v318_v37, %v296_v34 }
 0x11e   : > { %v329_v47 = vmax.f32 %v321_v39, 0.0  ;;  %v333_v48 = vmax.f32 %v325_v40, 0.0  ;;  %v323_v49 = vadd.f32 %v308_v38, %v288_v41  ;;  %v327_v50 = vadd.f32 %v318_v37, %v298_v42 }
 0x11f   : > { %336 = vst [vmem:[%s826_s7] sm:$0xff] %v328_v43  ;;  %340 = vst [vmem:[%s826_s7 + $0x20] sm:$0xff] %v332_v44  ;;  %v330_v51 = vmax.f32 %v322_v45, 0.0  ;;  %v334_v52 = vmax.f32 %v326_v46, 0.0 }
 0x120   : > { %337 = vst [vmem:[%s826_s7 + $0x8] sm:$0xff] %v329_v47  ;;  %341 = vst [vmem:[%s826_s7 + $0x28] sm:$0xff] %v333_v48  ;;  %v331_v53 = vmax.f32 %v323_v49, 0.0  ;;  %v335_v54 = vmax.f32 %v327_v50, 0.0 }
 0x121   : > { %338 = vst [vmem:[%s826_s7 + $0x10] sm:$0xff] %v330_v51  ;;  %342 = vst [vmem:[%s826_s7 + $0x30] sm:$0xff] %v334_v52 }
 0x122   : > { %339 = vst [vmem:[%s826_s7 + $0x18] sm:$0xff] %v331_v53  ;;  %343 = vst [vmem:[%s826_s7 + $0x38] sm:$0xff] %v335_v54 }
 0x123   : > { %586 = shalt.err (!%p583_p5)
}
 0x124   : > { %s587_s23 = scalar_lea.hbm %s837_s24, 1024  ;;  %s591_s30 = scalar_lea.hbm %s895_s3, 2048 }
 0x125   : > { %p588_p4 = scmp.ne.s32.totalorder %s837_s24, %s587_s23  ;;  %p592_p12 = scmp.lt.u32.totalorder %s837_s24, %s895_s3 }
 0x126   : > { %p593_p1 = scmp.lt.u32.totalorder %s591_s30, %s587_s23  ;;  %p595_p8 = scmp.lt.u32.totalorder %s587_s23, %s837_s24 }
 0x127   : > { %p589_p7 = pnand %p588_p4, %p903_p9 }
 0x128   : > { %p594_p3 = por %p593_p1, %p592_p12 }
 0x129   : > { %p590_p10 = pneg %p589_p7 }
 0x12a   : > { %p596_p11 = por %p595_p8, %p594_p3 }
 0x12c   : > { %p597_p0 = pnand %p596_p11, %p590_p10 }
 0x12e   : > { %600 = shalt.err (!%p597_p0)
}
 0x12f   : > { %s662_s7 = smov 256   ;;  %s663_s21 = smov 16  }
 0x130   : > { %474 = dma.vmem_to_hbm [thread:$0]  (%p903_p9), %s830_s19, 1024, %s837_s24, %s345_s6, %s662_s7, %s662_s7, %s663_s21  }
 0x131 PF: > { %s375_s15 = sand.u32 1, %s635_s12   ;;  %p904_p6 = scmp.ne.s32.totalorder %s900_s27, 0 }
 0x132   : > { %p905_p13 = scmp.ge.s32.totalorder %s655_s17, 2  ;;  %s376_s18 = scalar_lea.sflag [#allocation4], %s375_s15 }
 0x134   : > { %p481_p2 = pnand %p905_p13, %p904_p6 }
 0x136   : > { %630 = dma.done.wait (!%p481_p2), %s376_s18, 1024  }
 0x137   : > { %632 = vsyncadd (!%p481_p2), %s376_s18, 4294966272  ;;  %s19_s17 = sadd.s32 1, %s655_s17   ;;  %s906_s12 = smov %s639_s13 }
 0x138   : > { %p16_p5 = scmp.ge.s32.totalorder %s19_s17, 4   ;;  %s907_s13 = smov %s643_s14 }
 0x139   : > { %s908_s14 = smov %s740_s26  ;;  %s909_s15 = smov %s651_s16 }
 0x13a   : > { %s910_s16 = smov %s912_s20  ;;  %18 = sbr.rel (!%p16_p5) target bundleno = 6 (0x6), region = 77 }
 0x141   :  { %381 = vsyncpa [#allocation3], 1 }
 0x142   :  { %383 = vsyncpa [#allocation3 + $0x1], 1 }
 0x143   :  { %384 = vsyncpa [#allocation4], 1 }
 0x144   :  { %386 = vsyncpa [#allocation4 + $0x1], 1 }

</bundles_post_ra>
